<compile_context>
chip_gen: v6e
topology: v6e:2x2x1
jax: 0.10.0
libtpu: 0.0.40
codegen_flags: <defaults>
</compile_context>

<pallas_src>
import functools

import jax
import jax.numpy as jnp
from jax.experimental import pallas as pl
from jax.experimental.pallas import tpu as pltpu


def _round_up(n, m):
    return pl.cdiv(n, m) * m


def _shared_mlp_kernel(x_ref, w1_ref, b1_ref, w2_ref, b2_ref, out_ref):
    # Layer 1: Linear (bf16 MXU, f32 accumulate) + bias + ReLU in f32.
    h = jnp.dot(x_ref[...], w1_ref[...], preferred_element_type=jnp.float32)
    h = jnp.maximum(h + b1_ref[...], 0.0)          # b1 is (1, Hp) -> broadcast
    # Layer 2: Linear (cast hidden back to bf16 for the MXU) + bias + ReLU.
    o = jnp.dot(h.astype(w2_ref.dtype), w2_ref[...],
                preferred_element_type=jnp.float32)
    o = jnp.maximum(o + b2_ref[...], 0.0)
    out_ref[...] = o.astype(out_ref.dtype)


@functools.partial(jax.jit, static_argnames=("block_batch",))
def shared_network_pallas(x, w1, b1, w2, b2, *, block_batch=128):
    """Fused 2-layer MLP.  Pads lane dims to 128 multiples, tiles the batch
    axis (weights stay VMEM-resident across grid steps), bf16 MXU matmuls
    with f32 accumulation, then slices the padding back off."""
    batch, in_dim = x.shape
    hid_dim = w1.shape[1]
    out_dim = w2.shape[1]

    # Lane-dense padding (multiples of 128) and sublane-aligned batch tile.
    in_p = _round_up(in_dim, 128)
    hid_p = _round_up(hid_dim, 128)
    out_p = _round_up(out_dim, 128)
    tb = min(block_batch, _round_up(batch, 8))
    batch_p = _round_up(batch, tb)

    # Zero-pad (zero rows/cols contribute nothing; padded out lanes stay 0
    # because the padded bias entries are 0 and relu(0) == 0).
    xp = jnp.pad(x, ((0, batch_p - batch), (0, in_p - in_dim))).astype(jnp.bfloat16)
    w1p = jnp.pad(w1, ((0, in_p - in_dim), (0, hid_p - hid_dim))).astype(jnp.bfloat16)
    b1p = jnp.pad(b1, ((0, 0), (0, hid_p - hid_dim))).astype(jnp.float32)
    w2p = jnp.pad(w2, ((0, hid_p - hid_dim), (0, out_p - out_dim))).astype(jnp.bfloat16)
    b2p = jnp.pad(b2, ((0, 0), (0, out_p - out_dim))).astype(jnp.float32)

    grid = (batch_p // tb,)

    cost = pl.CostEstimate(
        flops=2 * batch_p * (in_p * hid_p + hid_p * out_p),
        transcendentals=0,
        bytes_accessed=(xp.size * 2 + w1p.size * 2 + w2p.size * 2
                        + b1p.size * 4 + b2p.size * 4 + batch_p * out_p * 4),
    )

    out_padded = pl.pallas_call(
        _shared_mlp_kernel,
        out_shape=jax.ShapeDtypeStruct((batch_p, out_p), jnp.float32),
        grid=grid,
        in_specs=[
            pl.BlockSpec((tb, in_p), lambda i: (i, 0)),      # x: tiled over batch
            pl.BlockSpec((in_p, hid_p), lambda i: (0, 0)),   # w1: resident
            pl.BlockSpec((1, hid_p), lambda i: (0, 0)),      # b1: resident
            pl.BlockSpec((hid_p, out_p), lambda i: (0, 0)),  # w2: resident
            pl.BlockSpec((1, out_p), lambda i: (0, 0)),      # b2: resident
        ],
        out_specs=pl.BlockSpec((tb, out_p), lambda i: (i, 0)),
        compiler_params=pltpu.CompilerParams(
            dimension_semantics=("parallel",)),              # megacore on v7x
        cost_estimate=cost,
    )(xp, w1p, b1p, w2p, b2p)

    return out_padded[:batch, :out_dim]


def singley_pingly_forward(obs, params):
    """SingleyPingly.forward: out = shared_network(obs); return (out, out)."""
    out = shared_network_pallas(obs, params["w1"], params["b1"],
                                params["w2"], params["b2"])
    return out, out


def init_params(key, in_dim, hidden_dim, out_dim):
    k1, k2, k3, k4 = jax.random.split(key, 4)
    scale1 = 1.0 / jnp.sqrt(in_dim)
    scale2 = 1.0 / jnp.sqrt(hidden_dim)
    return {
        "w1": jax.random.uniform(k1, (in_dim, hidden_dim), jnp.float32,
                                 -scale1, scale1),
        "b1": jax.random.uniform(k2, (1, hidden_dim), jnp.float32,
                                 -scale1, scale1),
        "w2": jax.random.uniform(k3, (hidden_dim, out_dim), jnp.float32,
                                 -scale2, scale2),
        "b2": jax.random.uniform(k4, (1, out_dim), jnp.float32,
                                 -scale2, scale2),
    }


if __name__ == "__main__":
    key = jax.random.PRNGKey(0)
    k_obs, k_par = jax.random.split(key)

    # latent_dim_pi == latent_dim_vf == out_dim (shared trunk).
    batch, in_dim, hidden_dim, out_dim = 256, 32, 64, 32
    obs = jax.random.normal(k_obs, (batch, in_dim), jnp.float32)
    params = init_params(k_par, in_dim, hidden_dim, out_dim)

    pi_latent, vf_latent = singley_pingly_forward(obs, params)
    jax.block_until_ready((pi_latent, vf_latent))

    # Reference: same bf16-weight / f32-accumulate arithmetic, pure JAX.
    w1b = params["w1"].astype(jnp.bfloat16)
    w2b = params["w2"].astype(jnp.bfloat16)
    h_ref = jnp.maximum(
        jnp.dot(obs.astype(jnp.bfloat16), w1b,
                preferred_element_type=jnp.float32) + params["b1"], 0.0)
    o_ref = jnp.maximum(
        jnp.dot(h_ref.astype(jnp.bfloat16), w2b,
                preferred_element_type=jnp.float32) + params["b2"], 0.0)

    assert pi_latent.shape == (batch, out_dim)
    assert jnp.allclose(pi_latent, vf_latent)           # forward returns (out, out)
    assert jnp.allclose(pi_latent, o_ref, atol=1e-3, rtol=1e-3)

    print("KERNEL_OK")
</pallas_src>

<mosaic_0001>
module attributes {stable_mosaic.version = 11 : i64} {
  func.func @_shared_mlp_kernel(%arg0: i32, %arg1: memref<128x128xbf16, #tpu.memory_space<vmem>>, %arg2: memref<128x128xbf16, #tpu.memory_space<vmem>>, %arg3: memref<1x128xf32, #tpu.memory_space<vmem>>, %arg4: memref<128x128xbf16, #tpu.memory_space<vmem>>, %arg5: memref<1x128xf32, #tpu.memory_space<vmem>>, %arg6: memref<128x128xf32, #tpu.memory_space<vmem>>) attributes {dimension_semantics = [#tpu.dimension_semantics<parallel>], iteration_bounds = array<i64: 2>, scalar_prefetch = 0 : i64, scratch_operands = 0 : i64, tpu.core_type = #tpu.core_type<tc>, window_params = [{transform_indices = @transform_0, window_bounds = array<i64: 128, 128>}, {pipeline_mode = #tpu.pipeline_mode<synchronous>, transform_indices = @transform_1, window_bounds = array<i64: 128, 128>}, {pipeline_mode = #tpu.pipeline_mode<synchronous>, transform_indices = @transform_2, window_bounds = array<i64: 1, 128>}, {pipeline_mode = #tpu.pipeline_mode<synchronous>, transform_indices = @transform_3, window_bounds = array<i64: 128, 128>}, {pipeline_mode = #tpu.pipeline_mode<synchronous>, transform_indices = @transform_4, window_bounds = array<i64: 1, 128>}, {transform_indices = @transform_5, window_bounds = array<i64: 128, 128>}]} {
    %c0 = arith.constant 0 : index
    %c0_0 = arith.constant 0 : index
    %0 = vector.load %arg1[%c0, %c0_0] : memref<128x128xbf16, #tpu.memory_space<vmem>>, vector<128x128xbf16>
    %c0_1 = arith.constant 0 : index
    %c0_2 = arith.constant 0 : index
    %1 = vector.load %arg2[%c0_1, %c0_2] : memref<128x128xbf16, #tpu.memory_space<vmem>>, vector<128x128xbf16>
    %cst = arith.constant dense<0.000000e+00> : vector<128x128xf32>
    %2 = tpu.matmul %0, %1, %cst {dimension_numbers = #tpu.dot_dimension_numbers<[1], [0], [0], [1], [0, 0, 1, 1], [], []>} : vector<128x128xbf16>, vector<128x128xbf16>, vector<128x128xf32> -> vector<128x128xf32>
    %c0_3 = arith.constant 0 : index
    %c0_4 = arith.constant 0 : index
    %3 = vector.load %arg3[%c0_3, %c0_4] : memref<1x128xf32, #tpu.memory_space<vmem>>, vector<1x128xf32>
    %4 = vector.broadcast %3 : vector<1x128xf32> to vector<128x128xf32>
    %5 = arith.addf %2, %4 : vector<128x128xf32>
    %cst_5 = arith.constant 0.000000e+00 : f32
    %6 = vector.broadcast %cst_5 : f32 to vector<128x128xf32>
    %7 = arith.maximumf %5, %6 : vector<128x128xf32>
    %8 = arith.truncf %7 : vector<128x128xf32> to vector<128x128xbf16>
    %c0_6 = arith.constant 0 : index
    %c0_7 = arith.constant 0 : index
    %9 = vector.load %arg4[%c0_6, %c0_7] : memref<128x128xbf16, #tpu.memory_space<vmem>>, vector<128x128xbf16>
    %cst_8 = arith.constant dense<0.000000e+00> : vector<128x128xf32>
    %10 = tpu.matmul %8, %9, %cst_8 {dimension_numbers = #tpu.dot_dimension_numbers<[1], [0], [0], [1], [0, 0, 1, 1], [], []>} : vector<128x128xbf16>, vector<128x128xbf16>, vector<128x128xf32> -> vector<128x128xf32>
    %c0_9 = arith.constant 0 : index
    %c0_10 = arith.constant 0 : index
    %11 = vector.load %arg5[%c0_9, %c0_10] : memref<1x128xf32, #tpu.memory_space<vmem>>, vector<1x128xf32>
    %12 = vector.broadcast %11 : vector<1x128xf32> to vector<128x128xf32>
    %13 = arith.addf %10, %12 : vector<128x128xf32>
    %cst_11 = arith.constant 0.000000e+00 : f32
    %14 = vector.broadcast %cst_11 : f32 to vector<128x128xf32>
    %15 = arith.maximumf %13, %14 : vector<128x128xf32>
    %c0_12 = arith.constant 0 : index
    %c0_13 = arith.constant 0 : index
    %16 = vector.load %arg6[%c0_12, %c0_13] : memref<128x128xf32, #tpu.memory_space<vmem>>, vector<128x128xf32>
    tpu.vector_store %arg6[%c0_12, %c0_13], %15 {strides = array<i32>} : memref<128x128xf32, #tpu.memory_space<vmem>>, vector<128x128xf32>,
    return
  }
  func.func @transform_0(%arg0: i32) -> (i32, i32) {
    %c0_i32 = arith.constant 0 : i32
    %c0_i32_0 = arith.constant 0 : i32
    return %arg0, %c0_i32 : i32, i32
  }
  func.func @transform_1(%arg0: i32) -> (i32, i32) {
    %c0_i32 = arith.constant 0 : i32
    %c0_i32_0 = arith.constant 0 : i32
    %c0_i32_1 = arith.constant 0 : i32
    return %c0_i32, %c0_i32_0 : i32, i32
  }
  func.func @transform_2(%arg0: i32) -> (i32, i32) {
    %c0_i32 = arith.constant 0 : i32
    %c0_i32_0 = arith.constant 0 : i32
    %c0_i32_1 = arith.constant 0 : i32
    return %c0_i32, %c0_i32_0 : i32, i32
  }
  func.func @transform_3(%arg0: i32) -> (i32, i32) {
    %c0_i32 = arith.constant 0 : i32
    %c0_i32_0 = arith.constant 0 : i32
    %c0_i32_1 = arith.constant 0 : i32
    return %c0_i32, %c0_i32_0 : i32, i32
  }
  func.func @transform_4(%arg0: i32) -> (i32, i32) {
    %c0_i32 = arith.constant 0 : i32
    %c0_i32_0 = arith.constant 0 : i32
    %c0_i32_1 = arith.constant 0 : i32
    return %c0_i32, %c0_i32_0 : i32, i32
  }
  func.func @transform_5(%arg0: i32) -> (i32, i32) {
    %c0_i32 = arith.constant 0 : i32
    %c0_i32_0 = arith.constant 0 : i32
    return %arg0, %c0_i32 : i32, i32
  }
}

</mosaic_0001>

<bundles_post_ra>
// kernel: shared_network_pallas.1
= control target key start
LH: loop header
LB: loop body
LE: loop exit
PB: predicated region body
PF: predicated region fallthrough
CT: control target
= control target key end

     0   :  { %s944_s18 = smov 0   ;;  %s1065_s0 = inlined_call_operand.vmem [shape: bf16[256,128], index: 0, kind: input, shape index: {}]   ;;  %s1066_s1 = inlined_call_operand.vmem [shape: bf16[128,128], index: 1, kind: input, shape index: {}]   ;;  %s1067_s2 = inlined_call_operand.vmem [shape: f32[1,128], index: 2, kind: input, shape index: {}]   ;;  %s1068_s3 = inlined_call_operand.vmem [shape: bf16[128,128], index: 3, kind: input, shape index: {}]   ;;  %s1069_s4 = inlined_call_operand.vmem [shape: f32[1,128], index: 4, kind: input, shape index: {}]   ;;  %s1070_s5 = inlined_call_operand.vmem [shape: f32[256,128], index: 5, kind: output, shape index: {}]  }
   0x1 LB: > { %s741_s19 = sadd.s32 4294967295, %s912_s18   ;;  %p745_p0 = scmp.ge.s32.totalorder %s912_s18, 1  ;;  %s912_s18 = sphi %s944_s18, %s15_s18  }
   0x2   : > { %p188_p1 = scmp.lt.s32.totalorder %s912_s18, 3 }
   0x4   : > { %p189_p2 = pnand %p745_p0, %p188_p1 }
   0x5   : > { %s746_s22 = sshll.u32 (!%p189_p2), %s741_s19, 4 }
   0x6   : > { %192 = sbr.rel (%p189_p2) target bundleno = 478 (0x1de), region = 40  ;;  %p217_p3 = scmp.lt.s32.totalorder (!%p189_p2), %s746_s22, 31 }
   0xb   : > { %v882_v0 = vld [vmem:[%s1066_s1 + $0x38] sm:$0xff]   ;;  %v883_v1 = vld [vmem:[%s1066_s1 + $0x30] sm:$0xff]   ;;  %s1072_s22 = smov (!%p217_p3, %s746_s22), 31  ;;  %v884_v2 = vld [vmem:[%s1066_s1 + $0x28] sm:$0xff]  }
   0xc   : > { %810 = vmatprep.subr.bf16.mxu0 %v882_v0  ;;  %s747_s27 = sshll.u32 %s1072_s22, 2  ;;  %v885_v3 = vld [vmem:[%s1066_s1 + $0x20] sm:$0xff]   ;;  %v886_v5 = vld [vmem:[%s1066_s1 + $0x18] sm:$0xff]   ;;  %v887_v6 = vld [vmem:[%s1066_s1 + $0x10] sm:$0xff]   ;;  %s749_s13 = sshll.u32 %s1072_s22, 3 }
   0xd   : > { %811 = vmatpush3.bf16.msra.mxu0 %v882_v0  ;;  %s967_s30 = scalar_lea.vmem %s1065_s0, %s747_s27  ;;  %v898_v7 = vld [vmem:[%s1068_s3 + $0x38] sm:$0xff]   ;;  %v899_v8 = vld [vmem:[%s1068_s3 + $0x30] sm:$0xff]   ;;  %v888_v9 = vld [vmem:[%s1066_s1 + $0x8] sm:$0xff]   ;;  %s1029_s16 = scalar_lea.vmem %s1070_s5, %s749_s13 }
   0xe   : > { %812 = vmatprep.subr.bf16.mxu0 %v883_v1  ;;  %v890_v4 = vld [vmem:[%s967_s30] sm:$0xff]   ;;  %842 = vmatprep.subr.bf16.mxu1 %v898_v7  ;;  %v900_v10 = vld [vmem:[%s1068_s3 + $0x28] sm:$0xff]   ;;  %v902_v13 = vld [vmem:[%s1068_s3 + $0x18] sm:$0xff]  }
   0xf   : > { %826 = vmatprep.mubr.bf16.mxu0 %v890_v4  ;;  %843 = vmatpush3.bf16.msra.mxu1 %v898_v7  ;;  %v889_v11 = vld [vmem:[%s1066_s1] sm:$0xff]   ;;  %v891_v14 = vld [vmem:[%s967_s30 + $0x8] sm:$0xff]   ;;  %v892_v15 = vld [vmem:[%s967_s30 + $0x10] sm:$0xff]  }
  0x10   : > { %844 = vmatprep.subr.bf16.mxu1 %v899_v8  ;;  %v901_v12 = vld [vmem:[%s1068_s3 + $0x20] sm:$0xff]   ;;  %v893_v16 = vld [vmem:[%s967_s30 + $0x18] sm:$0xff]   ;;  %v895_v18 = vld [vmem:[%s967_s30 + $0x28] sm:$0xff]  }
  0x11   : > { %813 = vmatpush3.bf16.msra.mxu0 %v883_v1  ;;  %v894_v17 = vld [vmem:[%s967_s30 + $0x20] sm:$0xff]   ;;  %v896_v19 = vld [vmem:[%s967_s30 + $0x30] sm:$0xff]   ;;  %v897_v20 = vld [vmem:[%s967_s30 + $0x38] sm:$0xff]  }
  0x12   : > { %814 = vmatprep.subr.bf16.mxu0 %v884_v2  ;;  %v903_v21 = vld [vmem:[%s1068_s3 + $0x10] sm:$0xff]   ;;  %v904_v22 = vld [vmem:[%s1068_s3 + $0x8] sm:$0xff]   ;;  %v905_v23 = vld [vmem:[%s1068_s3] sm:$0xff]  }
  0x13   : > { %845 = vmatpush3.bf16.msra.mxu1 %v899_v8  ;;  %v750_v26 = vld [vmem:[%s1067_s2] ss:$0 sm:$0xff] }
  0x14   : > { %846 = vmatprep.subr.bf16.mxu1 %v900_v10 }
  0x15   : > { %815 = vmatpush3.bf16.msra.mxu0 %v884_v2 }
  0x16   : > { %816 = vmatprep.subr.bf16.mxu0 %v885_v3 }
  0x17   : > { %847 = vmatpush3.bf16.msra.mxu1 %v900_v10 }
  0x18   : > { %848 = vmatprep.subr.bf16.mxu1 %v901_v12 }
  0x19   : > { %817 = vmatpush3.bf16.msra.mxu0 %v885_v3 }
  0x1a   : > { %818 = vmatprep.subr.bf16.mxu0 %v886_v5 }
  0x1b   : > { %849 = vmatpush3.bf16.msra.mxu1 %v901_v12 }
  0x1c   : > { %850 = vmatprep.subr.bf16.mxu1 %v902_v13 }
  0x1d   : > { %819 = vmatpush3.bf16.msra.mxu0 %v886_v5 }
  0x1e   : > { %820 = vmatprep.subr.bf16.mxu0 %v887_v6 }
  0x1f   : > { %851 = vmatpush3.bf16.msra.mxu1 %v902_v13 }
  0x20   : > { %852 = vmatprep.subr.bf16.mxu1 %v903_v21 }
  0x21   : > { %821 = vmatpush3.bf16.msra.mxu0 %v887_v6 }
  0x22   : > { %822 = vmatprep.subr.bf16.mxu0 %v888_v9 }
  0x23   : > { %853 = vmatpush3.bf16.msra.mxu1 %v903_v21 }
  0x24   : > { %854 = vmatprep.subr.bf16.mxu1 %v904_v22 }
  0x25   : > { %823 = vmatpush3.bf16.msra.mxu0 %v888_v9 }
  0x26   : > { %824 = vmatprep.subr.bf16.mxu0 %v889_v11 }
  0x27   : > { %855 = vmatpush3.bf16.msra.mxu1 %v904_v22 }
  0x28   : > { %856 = vmatprep.subr.bf16.mxu1 %v905_v23 }
  0x29   : > { %825 = vmatpush3.bf16.msra.mxu0 %v889_v11 }
  0x2b   : > { %857 = vmatpush3.bf16.msra.mxu1 %v905_v23 }
  0x2c   : > { %827 = vmatmul.mubr.bf16.vlgmr.msra.gmra.mxu0 %v891_v14 }
  0x2d   : > { %830 = vmatprep.mubr.bf16.mxu0 %v892_v15 }
  0x34   : > { %831 = vmatmul.mubr.bf16.gmra.mxu0 %v893_v16 }
  0x35   : > { %834 = vmatprep.mubr.bf16.mxu0 %v894_v17  ;;  %v1022_v17 = vld [vmem:[%s1069_s4] ss:$0 sm:$0xff] }
  0x3c   : > { %835 = vmatmul.mubr.bf16.gmra.mxu0 %v895_v18 }
  0x3d   : > { %838 = vmatprep.mubr.bf16.mxu0 %v896_v19 }
  0x44   : > { %839 = vmatmul.mubr.bf16.gmra.mxu0 %v897_v20 }
  0xec   : > { %v828_v24 = vpop.f32.mrf.mxu0 }
  0xed   : > { %v407_v30 = vadd.f32 %v828_v24, %v750_v26 }
  0xee   : > { %v398_v25 = vpop.f32.mrf.mxu0 }
  0xef   : > { %v399_v28 = vadd.f32 %v750_v26, %v398_v25  ;;  %v463_v37 = vmax.f32 %v407_v30, 0.0 }
  0xf0   : > { %v829_v27 = vpop.f32.mrf.mxu0 }
  0xf1   : > { %v410_v29 = vadd.f32 %v829_v27, %v750_v26  ;;  %v461_v35 = vmax.f32 %v399_v28, 0.0 }
  0xf2   : > { %v401_v31 = vpop.f32.mrf.mxu0 }
  0xf3   : > { %v402_v32 = vadd.f32 %v750_v26, %v401_v31  ;;  %v464_v33 = vmax.f32 %v410_v29, 0.0 }
  0xf4   : > { %v832_v34 = vpop.f32.mrf.mxu0 }
  0xf5   : > { %v462_v36 = vmax.f32 %v402_v32, 0.0  ;;  %v478_v40 = vpack.c.bf16 %v464_v33, %v463_v37  ;;  %v423_v44 = vadd.f32 %v832_v34, %v750_v26 }
  0xf6   : > { %v414_v38 = vpop.f32.mrf.mxu0 }
  0xf7   : > { %v477_v39 = vpack.c.bf16 %v462_v36, %v461_v35  ;;  %v415_v42 = vadd.f32 %v750_v26, %v414_v38  ;;  %v467_v51 = vmax.f32 %v423_v44, 0.0 }
  0xf8   : > { %v833_v41 = vpop.f32.mrf.mxu0 }
  0xf9   : > { %v426_v43 = vadd.f32 %v833_v41, %v750_v26  ;;  %858 = vmatprep.mubr.bf16.mxu1 %v477_v39  ;;  %v465_v49 = vmax.f32 %v415_v42, 0.0 }
  0xfa   : > { %v417_v45 = vpop.f32.mrf.mxu0  ;;  %859 = vmatmul.mubr.bf16.vlgmr.msra.gmra.mxu1 %v478_v40 }
  0xfb   : > { %v418_v46 = vadd.f32 %v750_v26, %v417_v45  ;;  %v468_v47 = vmax.f32 %v426_v43, 0.0 }
  0xfc   : > { %v836_v48 = vpop.f32.mrf.mxu0 }
  0xfd   : > { %v466_v50 = vmax.f32 %v418_v46, 0.0  ;;  %v480_v54 = vpack.c.bf16 %v468_v47, %v467_v51  ;;  %v439_v58 = vadd.f32 %v836_v48, %v750_v26 }
  0xfe   : > { %v430_v52 = vpop.f32.mrf.mxu0 }
  0xff   : > { %v479_v53 = vpack.c.bf16 %v466_v50, %v465_v49  ;;  %v431_v56 = vadd.f32 %v750_v26, %v430_v52  ;;  %v471_v1 = vmax.f32 %v439_v58, 0.0 }
 0x100   : > { %v837_v55 = vpop.f32.mrf.mxu0 }
 0x101   : > { %v442_v57 = vadd.f32 %v837_v55, %v750_v26  ;;  %862 = vmatprep.mubr.bf16.mxu1 %v479_v53  ;;  %v469_v63 = vmax.f32 %v431_v56, 0.0 }
 0x102   : > { %v433_v59 = vpop.f32.mrf.mxu0  ;;  %863 = vmatmul.mubr.bf16.gmra.mxu1 %v480_v54 }
 0x103   : > { %v434_v60 = vadd.f32 %v750_v26, %v433_v59  ;;  %v472_v61 = vmax.f32 %v442_v57, 0.0 }
 0x104   : > { %v840_v62 = vpop.f32.mrf.mxu0 }
 0x105   : > { %v470_v0 = vmax.f32 %v434_v60, 0.0  ;;  %v482_v4 = vpack.c.bf16 %v472_v61, %v471_v1  ;;  %v455_v8 = vadd.f32 %v840_v62, %v750_v26 }
 0x106   : > { %v446_v2 = vpop.f32.mrf.mxu0 }
 0x107   : > { %v481_v3 = vpack.c.bf16 %v470_v0, %v469_v63  ;;  %v447_v6 = vadd.f32 %v750_v26, %v446_v2  ;;  %v475_v14 = vmax.f32 %v455_v8, 0.0 }
 0x108   : > { %v841_v5 = vpop.f32.mrf.mxu0 }
 0x109   : > { %v458_v7 = vadd.f32 %v841_v5, %v750_v26  ;;  %866 = vmatprep.mubr.bf16.mxu1 %v481_v3  ;;  %v473_v12 = vmax.f32 %v447_v6, 0.0 }
 0x10a   : > { %v449_v9 = vpop.f32.mrf.mxu0  ;;  %867 = vmatmul.mubr.bf16.gmra.mxu1 %v482_v4 }
 0x10b   : > { %v450_v10 = vadd.f32 %v750_v26, %v449_v9  ;;  %v476_v11 = vmax.f32 %v458_v7, 0.0 }
 0x10d   : > { %v474_v13 = vmax.f32 %v450_v10, 0.0  ;;  %v484_v16 = vpack.c.bf16 %v476_v11, %v475_v14 }
 0x10f   : > { %v483_v15 = vpack.c.bf16 %v474_v13, %v473_v12 }
 0x111   : > { %870 = vmatprep.mubr.bf16.mxu1 %v483_v15 }
 0x112   : > { %871 = vmatmul.mubr.bf16.gmra.mxu1 %v484_v16 }
 0x1ba   : > { %v860_v18 = vpop.f32.mrf.mxu1 }
 0x1bb   : > { %v599_v19 = vadd.f32 %v860_v18, %v1022_v17 }
 0x1bc   : > { %v590_v20 = vpop.f32.mrf.mxu1 }
 0x1bd   : > { %v655_v21 = vmax.f32 %v599_v19, 0.0  ;;  %v591_v22 = vadd.f32 %v1022_v17, %v590_v20 }
 0x1be   : > { %v861_v23 = vpop.f32.mrf.mxu1 }
 0x1bf   : > { %671 = vst [vmem:[%s1029_s16 + $0x10] sm:$0xff] %v655_v21  ;;  %v653_v24 = vmax.f32 %v591_v22, 0.0  ;;  %v602_v25 = vadd.f32 %v861_v23, %v1022_v17 }
 0x1c0   : > { %v593_v26 = vpop.f32.mrf.mxu1 }
 0x1c1   : > { %669 = vst [vmem:[%s1029_s16] sm:$0xff] %v653_v24  ;;  %v656_v27 = vmax.f32 %v602_v25, 0.0  ;;  %v594_v28 = vadd.f32 %v1022_v17, %v593_v26 }
 0x1c2   : > { %v864_v29 = vpop.f32.mrf.mxu1 }
 0x1c3   : > { %672 = vst [vmem:[%s1029_s16 + $0x18] sm:$0xff] %v656_v27  ;;  %v654_v30 = vmax.f32 %v594_v28, 0.0  ;;  %v615_v31 = vadd.f32 %v864_v29, %v1022_v17 }
 0x1c4   : > { %v606_v32 = vpop.f32.mrf.mxu1 }
 0x1c5   : > { %670 = vst [vmem:[%s1029_s16 + $0x8] sm:$0xff] %v654_v30  ;;  %v659_v33 = vmax.f32 %v615_v31, 0.0  ;;  %v607_v34 = vadd.f32 %v1022_v17, %v606_v32 }
 0x1c6   : > { %v865_v35 = vpop.f32.mrf.mxu1 }
 0x1c7   : > { %675 = vst [vmem:[%s1029_s16 + $0x30] sm:$0xff] %v659_v33  ;;  %v657_v36 = vmax.f32 %v607_v34, 0.0  ;;  %v618_v37 = vadd.f32 %v865_v35, %v1022_v17 }
 0x1c8   : > { %v609_v38 = vpop.f32.mrf.mxu1 }
 0x1c9   : > { %673 = vst [vmem:[%s1029_s16 + $0x20] sm:$0xff] %v657_v36  ;;  %v660_v39 = vmax.f32 %v618_v37, 0.0  ;;  %v610_v40 = vadd.f32 %v1022_v17, %v609_v38 }
 0x1ca   : > { %v868_v41 = vpop.f32.mrf.mxu1 }
 0x1cb   : > { %676 = vst [vmem:[%s1029_s16 + $0x38] sm:$0xff] %v660_v39  ;;  %v658_v42 = vmax.f32 %v610_v40, 0.0  ;;  %v631_v43 = vadd.f32 %v868_v41, %v1022_v17 }
 0x1cc   : > { %v622_v44 = vpop.f32.mrf.mxu1 }
 0x1cd   : > { %674 = vst [vmem:[%s1029_s16 + $0x28] sm:$0xff] %v658_v42  ;;  %v663_v45 = vmax.f32 %v631_v43, 0.0  ;;  %v623_v46 = vadd.f32 %v1022_v17, %v622_v44 }
 0x1ce   : > { %v869_v47 = vpop.f32.mrf.mxu1 }
 0x1cf   : > { %679 = vst [vmem:[%s1029_s16 + $0x50] sm:$0xff] %v663_v45  ;;  %v661_v48 = vmax.f32 %v623_v46, 0.0  ;;  %v634_v49 = vadd.f32 %v869_v47, %v1022_v17 }
 0x1d0   : > { %v625_v50 = vpop.f32.mrf.mxu1 }
 0x1d1   : > { %677 = vst [vmem:[%s1029_s16 + $0x40] sm:$0xff] %v661_v48  ;;  %v664_v51 = vmax.f32 %v634_v49, 0.0  ;;  %v626_v52 = vadd.f32 %v1022_v17, %v625_v50 }
 0x1d2   : > { %v872_v53 = vpop.f32.mrf.mxu1 }
 0x1d3   : > { %680 = vst [vmem:[%s1029_s16 + $0x58] sm:$0xff] %v664_v51  ;;  %v662_v54 = vmax.f32 %v626_v52, 0.0  ;;  %v647_v55 = vadd.f32 %v872_v53, %v1022_v17 }
 0x1d4   : > { %v638_v56 = vpop.f32.mrf.mxu1 }
 0x1d5   : > { %678 = vst [vmem:[%s1029_s16 + $0x48] sm:$0xff] %v662_v54  ;;  %v667_v57 = vmax.f32 %v647_v55, 0.0  ;;  %v639_v58 = vadd.f32 %v1022_v17, %v638_v56 }
 0x1d6   : > { %v873_v59 = vpop.f32.mrf.mxu1 }
 0x1d7   : > { %683 = vst [vmem:[%s1029_s16 + $0x70] sm:$0xff] %v667_v57  ;;  %v665_v60 = vmax.f32 %v639_v58, 0.0  ;;  %v650_v61 = vadd.f32 %v873_v59, %v1022_v17 }
 0x1d8   : > { %v641_v62 = vpop.f32.mrf.mxu1 }
 0x1d9   : > { %681 = vst [vmem:[%s1029_s16 + $0x60] sm:$0xff] %v665_v60  ;;  %v668_v63 = vmax.f32 %v650_v61, 0.0  ;;  %v642_v0 = vadd.f32 %v1022_v17, %v641_v62 }
 0x1db   : > { %684 = vst [vmem:[%s1029_s16 + $0x78] sm:$0xff] %v668_v63  ;;  %v666_v1 = vmax.f32 %v642_v0, 0.0 }
 0x1dd   : > { %682 = vst [vmem:[%s1029_s16 + $0x68] sm:$0xff] %v666_v1 }
 0x1de PF: > { %s15_s18 = sadd.s32 1, %s912_s18  }
 0x1df   : > { %p12_p4 = scmp.ge.s32.totalorder %s15_s18, 4  }
 0x1e1   :  { %14 = sbr.rel (!%p12_p4) target bundleno = 1 (0x1), region = 70 }

</bundles_post_ra>
